<compile_context>
chip_gen: v7x
topology: tpu7x:2x2x1
jax: 0.10.0
libtpu: 0.0.40
codegen_flags: <defaults>
</compile_context>

<pallas_src>
import math

import jax
import jax.numpy as jnp
import numpy as np
from jax import lax
from jax.experimental import pallas as pl
from jax.experimental.pallas import tpu as pltpu  # noqa: F401


def _make_fused_attention_kernel(N, L, H, D, inv_scale):
    """Single-invocation fused kernel: projections + attention + fc_out.

    Shapes seen inside the kernel:
      kx_ref, qx_ref : (N*L, E)   flattened keys / queries
      madd_ref       : (N, L)     additive mask (0 or -1e20)
      wk/wq/wv_ref   : (E, E)     block-diagonal per-head W^T
      wo_ref         : (E, E)     fc_out weight, already transposed
      b_ref          : (1, E)     fc_out bias
      o_ref          : (N*L, E)
    """
    E = H * D

    def kernel(kx_ref, qx_ref, madd_ref, wk_ref, wq_ref, wv_ref, wo_ref,
               b_ref, o_ref):
        kx = kx_ref[...]        # (N*L, E)
        qx = qx_ref[...]        # (N*L, E)
        wo = wo_ref[...]        # (E, E)  == W_out^T
        bias = b_ref[...]       # (1, E)

        # Per-head Linear layers as single block-diagonal matmuls.
        k_proj = jnp.dot(kx, wk_ref[...], preferred_element_type=jnp.float32)
        q_proj = jnp.dot(qx, wq_ref[...], preferred_element_type=jnp.float32)
        # Reference quirk reproduced: values = v_linear(projected queries).
        v_proj = jnp.dot(q_proj, wv_ref[...], preferred_element_type=jnp.float32)

        # Fold 1/sqrt(E) into q (cheaper than scaling the (L, L) energy tile).
        q_scaled = q_proj * jnp.float32(inv_scale)

        # Statically unrolled loop over (batch, head): tiny tiles, all in VMEM,
        # no per-grid-step overhead.
        for n in range(N):
            rows = slice(n * L, (n + 1) * L)
            m_add = madd_ref[n:n + 1, :]               # (1, L) additive mask
            acc = jnp.zeros((L, E), jnp.float32)       # fused fc_out accumulator
            for h in range(H):
                cols = slice(h * D, (h + 1) * D)
                q_nh = q_scaled[rows, cols]            # (L, D)
                k_nh = k_proj[rows, cols]              # (L, D)
                v_nh = v_proj[rows, cols]              # (L, D)

                # q @ k^T without an explicit transpose: contract dim 1 / dim 1.
                energy = lax.dot_general(
                    q_nh, k_nh, (((1,), (1,)), ((), ())),
                    preferred_element_type=jnp.float32)            # (L, L)
                energy = energy + m_add                            # additive mask

                # softmax along the key axis (f32 throughout).
                mx = jnp.max(energy, axis=-1, keepdims=True)
                e = jnp.exp(energy - mx)
                s = jnp.sum(e, axis=-1, keepdims=True)
                p = e * pl.reciprocal(s, approx=True)              # EUP reciprocal

                att = jnp.dot(p, v_nh, preferred_element_type=jnp.float32)  # (L, D)
                # Fused output projection: accumulate att @ W_out^T[head rows].
                acc = acc + jnp.dot(att, wo[cols, :],
                                    preferred_element_type=jnp.float32)
            # Lane-dense store: full last dim E, sublane-aligned row offset.
            o_ref[rows, :] = (acc + bias).astype(o_ref.dtype)

    return kernel


def self_attention_pallas(keys, queries, values, mask, params, num_heads):
    """Pallas equivalent of SelfAttention.forward.

    keys, queries, values: (N, L, E) float32   (values is unused, see NOTE)
    mask: (N, L) int32 (0 = masked out)
    """
    del values  # unused, exactly as in the reference module
    wk, wq, wv, w_out, b_out = params
    N, L, E = queries.shape
    H = num_heads
    D = E // H
    inv_scale = 1.0 / math.sqrt(E)

    # One-time weight prep outside the kernel:
    #   block-diag(W^T, ..., W^T)  turns the per-head (D, D) Linear into a
    #   single (N*L, E) x (E, E) matmul; fc_out weight is pre-transposed.
    eye = jnp.eye(H, dtype=wk.dtype)
    wk_bd = jnp.kron(eye, wk.T)          # (E, E)
    wq_bd = jnp.kron(eye, wq.T)          # (E, E)
    wv_bd = jnp.kron(eye, wv.T)          # (E, E)
    wo_t = w_out.T                       # (E, E)

    # Flattened inputs: row n*L + l, column h*D + d  (matches reshape(N,L,H,D)).
    kx = keys.reshape(N * L, E)
    qx = queries.reshape(N * L, E)
    # Additive mask: 0 where visible, -1e20 where masked (broadcast over queries).
    mask_add = jnp.where(mask == 0, jnp.float32(-1e20), jnp.float32(0.0))

    out = pl.pallas_call(
        _make_fused_attention_kernel(N, L, H, D, inv_scale),
        out_shape=jax.ShapeDtypeStruct((N * L, E), jnp.float32),
        in_specs=[
            pl.BlockSpec((N * L, E), lambda: (0, 0)),   # keys (flattened)
            pl.BlockSpec((N * L, E), lambda: (0, 0)),   # queries (flattened)
            pl.BlockSpec((N, L), lambda: (0, 0)),       # additive mask
            pl.BlockSpec((E, E), lambda: (0, 0)),       # block-diag Wk^T
            pl.BlockSpec((E, E), lambda: (0, 0)),       # block-diag Wq^T
            pl.BlockSpec((E, E), lambda: (0, 0)),       # block-diag Wv^T
            pl.BlockSpec((E, E), lambda: (0, 0)),       # W_out^T
            pl.BlockSpec((1, E), lambda: (0, 0)),       # b_out
        ],
        out_specs=pl.BlockSpec((N * L, E), lambda: (0, 0)),
    )(kx, qx, mask_add, wk_bd, wq_bd, wv_bd, wo_t, b_out.reshape(1, E))

    return out.reshape(N, L, E)


def self_attention_reference(keys, queries, values, mask, params, num_heads):
    """Pure-JAX replica of the PyTorch forward (for verification)."""
    wk, wq, wv, w_out, b_out = params
    N, L, E = queries.shape
    H = num_heads
    D = E // H
    k = keys.reshape(N, L, H, D) @ wk.T
    q = queries.reshape(N, L, H, D) @ wq.T
    v = q @ wv.T  # same quirk as reference: values come from projected queries
    energy = jnp.einsum("nqhd,nkhd->nhqk", q, k)
    m = mask[:, None, None, :]
    energy = jnp.where(m == 0, jnp.float32(-1e20), energy)
    p = jax.nn.softmax(energy / math.sqrt(E), axis=3)
    att = jnp.einsum("nhql,nlhd->nqhd", p, v).reshape(N, L, E)
    return att @ w_out.T + b_out


if __name__ == "__main__":
    # Small shapes consistent with the module.
    N, L, E, H = 2, 8, 32, 4
    D = E // H

    key = jax.random.PRNGKey(0)
    k_keys, k_q, k_v, k_mask, k_wk, k_wq, k_wv, k_wo, k_bo = jax.random.split(key, 9)

    keys_in = jax.random.normal(k_keys, (N, L, E), dtype=jnp.float32)
    queries_in = jax.random.normal(k_q, (N, L, E), dtype=jnp.float32)
    values_in = jax.random.normal(k_v, (N, L, E), dtype=jnp.float32)

    mask = (jax.random.uniform(k_mask, (N, L)) > 0.3).astype(jnp.int32)
    mask = mask.at[:, 0].set(1)  # at least one visible key per row

    # Deterministic parameter init (PyTorch-default-style uniform ranges).
    bd = 1.0 / math.sqrt(D)
    be = 1.0 / math.sqrt(E)
    wk = jax.random.uniform(k_wk, (D, D), minval=-bd, maxval=bd, dtype=jnp.float32)
    wq = jax.random.uniform(k_wq, (D, D), minval=-bd, maxval=bd, dtype=jnp.float32)
    wv = jax.random.uniform(k_wv, (D, D), minval=-bd, maxval=bd, dtype=jnp.float32)
    w_out = jax.random.uniform(k_wo, (E, E), minval=-be, maxval=be, dtype=jnp.float32)
    b_out = jax.random.uniform(k_bo, (E,), minval=-be, maxval=be, dtype=jnp.float32)
    params = (wk, wq, wv, w_out, b_out)

    out = self_attention_pallas(keys_in, queries_in, values_in, mask, params, H)
    out = jax.block_until_ready(out)

    ref = self_attention_reference(keys_in, queries_in, values_in, mask, params, H)
    # Tolerance accounts for the EUP approximate reciprocal in the softmax
    # denominator; real structural errors would be orders of magnitude larger.
    np.testing.assert_allclose(np.asarray(out), np.asarray(ref), rtol=1e-2, atol=1e-2)

    print("KERNEL_OK")
</pallas_src>

<mosaic_0001>
module attributes {stable_mosaic.version = 11 : i64} {
  func.func @kernel(%arg0: memref<16x32xf32, #tpu.memory_space<vmem>>, %arg1: memref<16x32xf32, #tpu.memory_space<vmem>>, %arg2: memref<2x8xf32, #tpu.memory_space<vmem>>, %arg3: memref<32x32xf32, #tpu.memory_space<vmem>>, %arg4: memref<32x32xf32, #tpu.memory_space<vmem>>, %arg5: memref<32x32xf32, #tpu.memory_space<vmem>>, %arg6: memref<32x32xf32, #tpu.memory_space<vmem>>, %arg7: memref<1x32xf32, #tpu.memory_space<vmem>>, %arg8: memref<16x32xf32, #tpu.memory_space<vmem>>) attributes {dimension_semantics = [], scalar_prefetch = 0 : i64, scratch_operands = 0 : i64, tpu.core_type = #tpu.core_type<tc>} {
    %c0 = arith.constant 0 : index
    %c0_0 = arith.constant 0 : index
    %0 = vector.load %arg0[%c0, %c0_0] : memref<16x32xf32, #tpu.memory_space<vmem>>, vector<16x32xf32>
    %c0_1 = arith.constant 0 : index
    %c0_2 = arith.constant 0 : index
    %1 = vector.load %arg1[%c0_1, %c0_2] : memref<16x32xf32, #tpu.memory_space<vmem>>, vector<16x32xf32>
    %c0_3 = arith.constant 0 : index
    %c0_4 = arith.constant 0 : index
    %2 = vector.load %arg6[%c0_3, %c0_4] : memref<32x32xf32, #tpu.memory_space<vmem>>, vector<32x32xf32>
    %c0_5 = arith.constant 0 : index
    %c0_6 = arith.constant 0 : index
    %3 = vector.load %arg7[%c0_5, %c0_6] : memref<1x32xf32, #tpu.memory_space<vmem>>, vector<1x32xf32>
    %c0_7 = arith.constant 0 : index
    %c0_8 = arith.constant 0 : index
    %4 = vector.load %arg3[%c0_7, %c0_8] : memref<32x32xf32, #tpu.memory_space<vmem>>, vector<32x32xf32>
    %cst = arith.constant dense<0.000000e+00> : vector<16x32xf32>
    %5 = tpu.matmul %0, %4, %cst {dimension_numbers = #tpu.dot_dimension_numbers<[1], [0], [0], [1], [0, 0, 1, 1], [], []>} : vector<16x32xf32>, vector<32x32xf32>, vector<16x32xf32> -> vector<16x32xf32>
    %c0_9 = arith.constant 0 : index
    %c0_10 = arith.constant 0 : index
    %6 = vector.load %arg4[%c0_9, %c0_10] : memref<32x32xf32, #tpu.memory_space<vmem>>, vector<32x32xf32>
    %cst_11 = arith.constant dense<0.000000e+00> : vector<16x32xf32>
    %7 = tpu.matmul %1, %6, %cst_11 {dimension_numbers = #tpu.dot_dimension_numbers<[1], [0], [0], [1], [0, 0, 1, 1], [], []>} : vector<16x32xf32>, vector<32x32xf32>, vector<16x32xf32> -> vector<16x32xf32>
    %c0_12 = arith.constant 0 : index
    %c0_13 = arith.constant 0 : index
    %8 = vector.load %arg5[%c0_12, %c0_13] : memref<32x32xf32, #tpu.memory_space<vmem>>, vector<32x32xf32>
    %cst_14 = arith.constant dense<0.000000e+00> : vector<16x32xf32>
    %9 = tpu.matmul %7, %8, %cst_14 {dimension_numbers = #tpu.dot_dimension_numbers<[1], [0], [0], [1], [0, 0, 1, 1], [], []>} : vector<16x32xf32>, vector<32x32xf32>, vector<16x32xf32> -> vector<16x32xf32>
    %cst_15 = arith.constant 0.176776692 : f32
    %10 = vector.broadcast %cst_15 : f32 to vector<16x32xf32>
    %11 = arith.mulf %7, %10 : vector<16x32xf32>
    %c0_16 = arith.constant 0 : index
    %c0_17 = arith.constant 0 : index
    %12 = vector.load %arg2[%c0_16, %c0_17] : memref<2x8xf32, #tpu.memory_space<vmem>>, vector<1x8xf32>
    %cst_18 = arith.constant 0.000000e+00 : f32
    %13 = vector.broadcast %cst_18 : f32 to vector<8x32xf32>
    %14 = vector.extract_strided_slice %11 {offsets = [0, 0], sizes = [8, 8], strides = [1, 1]} : vector<16x32xf32> to vector<8x8xf32>
    %15 = vector.extract_strided_slice %5 {offsets = [0, 0], sizes = [8, 8], strides = [1, 1]} : vector<16x32xf32> to vector<8x8xf32>
    %16 = vector.extract_strided_slice %9 {offsets = [0, 0], sizes = [8, 8], strides = [1, 1]} : vector<16x32xf32> to vector<8x8xf32>
    %cst_19 = arith.constant dense<0.000000e+00> : vector<8x8xf32>
    %17 = tpu.matmul %14, %15, %cst_19 {dimension_numbers = #tpu.dot_dimension_numbers<[1], [1], [0], [0], [0, 0, 1, 0], [], []>} : vector<8x8xf32>, vector<8x8xf32>, vector<8x8xf32> -> vector<8x8xf32>
    %18 = vector.broadcast %12 : vector<1x8xf32> to vector<8x8xf32>
    %19 = arith.addf %17, %18 : vector<8x8xf32>
    %cst_20 = arith.constant dense<0xFF800000> : vector<8xf32>
    %20 = vector.multi_reduction <maximumf>, %19, %cst_20 [1] : vector<8x8xf32> to vector<8xf32>
    %21 = vector.shape_cast %20 : vector<8xf32> to vector<8x1xf32>
    %22 = vector.broadcast %21 : vector<8x1xf32> to vector<8x8xf32>
    %23 = arith.subf %19, %22 : vector<8x8xf32>
    %24 = math.exp %23 : vector<8x8xf32>
    %cst_21 = arith.constant dense<0.000000e+00> : vector<8xf32>
    %25 = vector.multi_reduction <add>, %24, %cst_21 [1] : vector<8x8xf32> to vector<8xf32>
    %26 = vector.shape_cast %25 : vector<8xf32> to vector<8x1xf32>
    %27 = tpu.reciprocal %26 {approx = true} : vector<8x1xf32> -> vector<8x1xf32>
    %28 = vector.broadcast %27 : vector<8x1xf32> to vector<8x8xf32>
    %29 = arith.mulf %24, %28 : vector<8x8xf32>
    %cst_22 = arith.constant dense<0.000000e+00> : vector<8x8xf32>
    %30 = tpu.matmul %29, %16, %cst_22 {dimension_numbers = #tpu.dot_dimension_numbers<[1], [0], [0], [1], [0, 0, 1, 1], [], []>} : vector<8x8xf32>, vector<8x8xf32>, vector<8x8xf32> -> vector<8x8xf32>
    %31 = vector.extract_strided_slice %2 {offsets = [0, 0], sizes = [8, 32], strides = [1, 1]} : vector<32x32xf32> to vector<8x32xf32>
    %cst_23 = arith.constant dense<0.000000e+00> : vector<8x32xf32>
    %32 = tpu.matmul %30, %31, %cst_23 {dimension_numbers = #tpu.dot_dimension_numbers<[1], [0], [0], [1], [0, 0, 1, 1], [], []>} : vector<8x8xf32>, vector<8x32xf32>, vector<8x32xf32> -> vector<8x32xf32>
    %33 = arith.addf %13, %32 : vector<8x32xf32>
    %34 = vector.extract_strided_slice %11 {offsets = [0, 8], sizes = [8, 8], strides = [1, 1]} : vector<16x32xf32> to vector<8x8xf32>
    %35 = vector.extract_strided_slice %5 {offsets = [0, 8], sizes = [8, 8], strides = [1, 1]} : vector<16x32xf32> to vector<8x8xf32>
    %36 = vector.extract_strided_slice %9 {offsets = [0, 8], sizes = [8, 8], strides = [1, 1]} : vector<16x32xf32> to vector<8x8xf32>
    %cst_24 = arith.constant dense<0.000000e+00> : vector<8x8xf32>
    %37 = tpu.matmul %34, %35, %cst_24 {dimension_numbers = #tpu.dot_dimension_numbers<[1], [1], [0], [0], [0, 0, 1, 0], [], []>} : vector<8x8xf32>, vector<8x8xf32>, vector<8x8xf32> -> vector<8x8xf32>
    %38 = vector.broadcast %12 : vector<1x8xf32> to vector<8x8xf32>
    %39 = arith.addf %37, %38 : vector<8x8xf32>
    %cst_25 = arith.constant dense<0xFF800000> : vector<8xf32>
    %40 = vector.multi_reduction <maximumf>, %39, %cst_25 [1] : vector<8x8xf32> to vector<8xf32>
    %41 = vector.shape_cast %40 : vector<8xf32> to vector<8x1xf32>
    %42 = vector.broadcast %41 : vector<8x1xf32> to vector<8x8xf32>
    %43 = arith.subf %39, %42 : vector<8x8xf32>
    %44 = math.exp %43 : vector<8x8xf32>
    %cst_26 = arith.constant dense<0.000000e+00> : vector<8xf32>
    %45 = vector.multi_reduction <add>, %44, %cst_26 [1] : vector<8x8xf32> to vector<8xf32>
    %46 = vector.shape_cast %45 : vector<8xf32> to vector<8x1xf32>
    %47 = tpu.reciprocal %46 {approx = true} : vector<8x1xf32> -> vector<8x1xf32>
    %48 = vector.broadcast %47 : vector<8x1xf32> to vector<8x8xf32>
    %49 = arith.mulf %44, %48 : vector<8x8xf32>
    %cst_27 = arith.constant dense<0.000000e+00> : vector<8x8xf32>
    %50 = tpu.matmul %49, %36, %cst_27 {dimension_numbers = #tpu.dot_dimension_numbers<[1], [0], [0], [1], [0, 0, 1, 1], [], []>} : vector<8x8xf32>, vector<8x8xf32>, vector<8x8xf32> -> vector<8x8xf32>
    %51 = vector.extract_strided_slice %2 {offsets = [8, 0], sizes = [8, 32], strides = [1, 1]} : vector<32x32xf32> to vector<8x32xf32>
    %cst_28 = arith.constant dense<0.000000e+00> : vector<8x32xf32>
    %52 = tpu.matmul %50, %51, %cst_28 {dimension_numbers = #tpu.dot_dimension_numbers<[1], [0], [0], [1], [0, 0, 1, 1], [], []>} : vector<8x8xf32>, vector<8x32xf32>, vector<8x32xf32> -> vector<8x32xf32>
    %53 = arith.addf %33, %52 : vector<8x32xf32>
    %54 = vector.extract_strided_slice %11 {offsets = [0, 16], sizes = [8, 8], strides = [1, 1]} : vector<16x32xf32> to vector<8x8xf32>
    %55 = vector.extract_strided_slice %5 {offsets = [0, 16], sizes = [8, 8], strides = [1, 1]} : vector<16x32xf32> to vector<8x8xf32>
    %56 = vector.extract_strided_slice %9 {offsets = [0, 16], sizes = [8, 8], strides = [1, 1]} : vector<16x32xf32> to vector<8x8xf32>
    %cst_29 = arith.constant dense<0.000000e+00> : vector<8x8xf32>
    %57 = tpu.matmul %54, %55, %cst_29 {dimension_numbers = #tpu.dot_dimension_numbers<[1], [1], [0], [0], [0, 0, 1, 0], [], []>} : vector<8x8xf32>, vector<8x8xf32>, vector<8x8xf32> -> vector<8x8xf32>
    %58 = vector.broadcast %12 : vector<1x8xf32> to vector<8x8xf32>
    %59 = arith.addf %57, %58 : vector<8x8xf32>
    %cst_30 = arith.constant dense<0xFF800000> : vector<8xf32>
    %60 = vector.multi_reduction <maximumf>, %59, %cst_30 [1] : vector<8x8xf32> to vector<8xf32>
    %61 = vector.shape_cast %60 : vector<8xf32> to vector<8x1xf32>
    %62 = vector.broadcast %61 : vector<8x1xf32> to vector<8x8xf32>
    %63 = arith.subf %59, %62 : vector<8x8xf32>
    %64 = math.exp %63 : vector<8x8xf32>
    %cst_31 = arith.constant dense<0.000000e+00> : vector<8xf32>
    %65 = vector.multi_reduction <add>, %64, %cst_31 [1] : vector<8x8xf32> to vector<8xf32>
    %66 = vector.shape_cast %65 : vector<8xf32> to vector<8x1xf32>
    %67 = tpu.reciprocal %66 {approx = true} : vector<8x1xf32> -> vector<8x1xf32>
    %68 = vector.broadcast %67 : vector<8x1xf32> to vector<8x8xf32>
    %69 = arith.mulf %64, %68 : vector<8x8xf32>
    %cst_32 = arith.constant dense<0.000000e+00> : vector<8x8xf32>
    %70 = tpu.matmul %69, %56, %cst_32 {dimension_numbers = #tpu.dot_dimension_numbers<[1], [0], [0], [1], [0, 0, 1, 1], [], []>} : vector<8x8xf32>, vector<8x8xf32>, vector<8x8xf32> -> vector<8x8xf32>
    %71 = vector.extract_strided_slice %2 {offsets = [16, 0], sizes = [8, 32], strides = [1, 1]} : vector<32x32xf32> to vector<8x32xf32>
    %cst_33 = arith.constant dense<0.000000e+00> : vector<8x32xf32>
    %72 = tpu.matmul %70, %71, %cst_33 {dimension_numbers = #tpu.dot_dimension_numbers<[1], [0], [0], [1], [0, 0, 1, 1], [], []>} : vector<8x8xf32>, vector<8x32xf32>, vector<8x32xf32> -> vector<8x32xf32>
    %73 = arith.addf %53, %72 : vector<8x32xf32>
    %74 = vector.extract_strided_slice %11 {offsets = [0, 24], sizes = [8, 8], strides = [1, 1]} : vector<16x32xf32> to vector<8x8xf32>
    %75 = vector.extract_strided_slice %5 {offsets = [0, 24], sizes = [8, 8], strides = [1, 1]} : vector<16x32xf32> to vector<8x8xf32>
    %76 = vector.extract_strided_slice %9 {offsets = [0, 24], sizes = [8, 8], strides = [1, 1]} : vector<16x32xf32> to vector<8x8xf32>
    %cst_34 = arith.constant dense<0.000000e+00> : vector<8x8xf32>
    %77 = tpu.matmul %74, %75, %cst_34 {dimension_numbers = #tpu.dot_dimension_numbers<[1], [1], [0], [0], [0, 0, 1, 0], [], []>} : vector<8x8xf32>, vector<8x8xf32>, vector<8x8xf32> -> vector<8x8xf32>
    %78 = vector.broadcast %12 : vector<1x8xf32> to vector<8x8xf32>
    %79 = arith.addf %77, %78 : vector<8x8xf32>
    %cst_35 = arith.constant dense<0xFF800000> : vector<8xf32>
    %80 = vector.multi_reduction <maximumf>, %79, %cst_35 [1] : vector<8x8xf32> to vector<8xf32>
    %81 = vector.shape_cast %80 : vector<8xf32> to vector<8x1xf32>
    %82 = vector.broadcast %81 : vector<8x1xf32> to vector<8x8xf32>
    %83 = arith.subf %79, %82 : vector<8x8xf32>
    %84 = math.exp %83 : vector<8x8xf32>
    %cst_36 = arith.constant dense<0.000000e+00> : vector<8xf32>
    %85 = vector.multi_reduction <add>, %84, %cst_36 [1] : vector<8x8xf32> to vector<8xf32>
    %86 = vector.shape_cast %85 : vector<8xf32> to vector<8x1xf32>
    %87 = tpu.reciprocal %86 {approx = true} : vector<8x1xf32> -> vector<8x1xf32>
    %88 = vector.broadcast %87 : vector<8x1xf32> to vector<8x8xf32>
    %89 = arith.mulf %84, %88 : vector<8x8xf32>
    %cst_37 = arith.constant dense<0.000000e+00> : vector<8x8xf32>
    %90 = tpu.matmul %89, %76, %cst_37 {dimension_numbers = #tpu.dot_dimension_numbers<[1], [0], [0], [1], [0, 0, 1, 1], [], []>} : vector<8x8xf32>, vector<8x8xf32>, vector<8x8xf32> -> vector<8x8xf32>
    %91 = vector.extract_strided_slice %2 {offsets = [24, 0], sizes = [8, 32], strides = [1, 1]} : vector<32x32xf32> to vector<8x32xf32>
    %cst_38 = arith.constant dense<0.000000e+00> : vector<8x32xf32>
    %92 = tpu.matmul %90, %91, %cst_38 {dimension_numbers = #tpu.dot_dimension_numbers<[1], [0], [0], [1], [0, 0, 1, 1], [], []>} : vector<8x8xf32>, vector<8x32xf32>, vector<8x32xf32> -> vector<8x32xf32>
    %93 = arith.addf %73, %92 : vector<8x32xf32>
    %94 = vector.broadcast %3 : vector<1x32xf32> to vector<8x32xf32>
    %95 = arith.addf %93, %94 : vector<8x32xf32>
    %c0_39 = arith.constant 0 : index
    %c0_40 = arith.constant 0 : index
    %96 = vector.load %arg8[%c0_39, %c0_40] : memref<16x32xf32, #tpu.memory_space<vmem>>, vector<8x32xf32>
    tpu.vector_store %arg8[%c0_39, %c0_40], %95 {strides = array<i32>} : memref<16x32xf32, #tpu.memory_space<vmem>>, vector<8x32xf32>,
    %c1 = arith.constant 1 : index
    %c0_41 = arith.constant 0 : index
    %97 = vector.load %arg2[%c1, %c0_41] : memref<2x8xf32, #tpu.memory_space<vmem>>, vector<1x8xf32>
    %cst_42 = arith.constant 0.000000e+00 : f32
    %98 = vector.broadcast %cst_42 : f32 to vector<8x32xf32>
    %99 = vector.extract_strided_slice %11 {offsets = [8, 0], sizes = [8, 8], strides = [1, 1]} : vector<16x32xf32> to vector<8x8xf32>
    %100 = vector.extract_strided_slice %5 {offsets = [8, 0], sizes = [8, 8], strides = [1, 1]} : vector<16x32xf32> to vector<8x8xf32>
    %101 = vector.extract_strided_slice %9 {offsets = [8, 0], sizes = [8, 8], strides = [1, 1]} : vector<16x32xf32> to vector<8x8xf32>
    %cst_43 = arith.constant dense<0.000000e+00> : vector<8x8xf32>
    %102 = tpu.matmul %99, %100, %cst_43 {dimension_numbers = #tpu.dot_dimension_numbers<[1], [1], [0], [0], [0, 0, 1, 0], [], []>} : vector<8x8xf32>, vector<8x8xf32>, vector<8x8xf32> -> vector<8x8xf32>
    %103 = vector.broadcast %97 : vector<1x8xf32> to vector<8x8xf32>
    %104 = arith.addf %102, %103 : vector<8x8xf32>
    %cst_44 = arith.constant dense<0xFF800000> : vector<8xf32>
    %105 = vector.multi_reduction <maximumf>, %104, %cst_44 [1] : vector<8x8xf32> to vector<8xf32>
    %106 = vector.shape_cast %105 : vector<8xf32> to vector<8x1xf32>
    %107 = vector.broadcast %106 : vector<8x1xf32> to vector<8x8xf32>
    %108 = arith.subf %104, %107 : vector<8x8xf32>
    %109 = math.exp %108 : vector<8x8xf32>
    %cst_45 = arith.constant dense<0.000000e+00> : vector<8xf32>
    %110 = vector.multi_reduction <add>, %109, %cst_45 [1] : vector<8x8xf32> to vector<8xf32>
    %111 = vector.shape_cast %110 : vector<8xf32> to vector<8x1xf32>
    %112 = tpu.reciprocal %111 {approx = true} : vector<8x1xf32> -> vector<8x1xf32>
    %113 = vector.broadcast %112 : vector<8x1xf32> to vector<8x8xf32>
    %114 = arith.mulf %109, %113 : vector<8x8xf32>
    %cst_46 = arith.constant dense<0.000000e+00> : vector<8x8xf32>
    %115 = tpu.matmul %114, %101, %cst_46 {dimension_numbers = #tpu.dot_dimension_numbers<[1], [0], [0], [1], [0, 0, 1, 1], [], []>} : vector<8x8xf32>, vector<8x8xf32>, vector<8x8xf32> -> vector<8x8xf32>
    %116 = vector.extract_strided_slice %2 {offsets = [0, 0], sizes = [8, 32], strides = [1, 1]} : vector<32x32xf32> to vector<8x32xf32>
    %cst_47 = arith.constant dense<0.000000e+00> : vector<8x32xf32>
    %117 = tpu.matmul %115, %116, %cst_47 {dimension_numbers = #tpu.dot_dimension_numbers<[1], [0], [0], [1], [0, 0, 1, 1], [], []>} : vector<8x8xf32>, vector<8x32xf32>, vector<8x32xf32> -> vector<8x32xf32>
    %118 = arith.addf %98, %117 : vector<8x32xf32>
    %119 = vector.extract_strided_slice %11 {offsets = [8, 8], sizes = [8, 8], strides = [1, 1]} : vector<16x32xf32> to vector<8x8xf32>
    %120 = vector.extract_strided_slice %5 {offsets = [8, 8], sizes = [8, 8], strides = [1, 1]} : vector<16x32xf32> to vector<8x8xf32>
    %121 = vector.extract_strided_slice %9 {offsets = [8, 8], sizes = [8, 8], strides = [1, 1]} : vector<16x32xf32> to vector<8x8xf32>
    %cst_48 = arith.constant dense<0.000000e+00> : vector<8x8xf32>
    %122 = tpu.matmul %119, %120, %cst_48 {dimension_numbers = #tpu.dot_dimension_numbers<[1], [1], [0], [0], [0, 0, 1, 0], [], []>} : vector<8x8xf32>, vector<8x8xf32>, vector<8x8xf32> -> vector<8x8xf32>
    %123 = vector.broadcast %97 : vector<1x8xf32> to vector<8x8xf32>
    %124 = arith.addf %122, %123 : vector<8x8xf32>
    %cst_49 = arith.constant dense<0xFF800000> : vector<8xf32>
    %125 = vector.multi_reduction <maximumf>, %124, %cst_49 [1] : vector<8x8xf32> to vector<8xf32>
    %126 = vector.shape_cast %125 : vector<8xf32> to vector<8x1xf32>
    %127 = vector.broadcast %126 : vector<8x1xf32> to vector<8x8xf32>
    %128 = arith.subf %124, %127 : vector<8x8xf32>
    %129 = math.exp %128 : vector<8x8xf32>
    %cst_50 = arith.constant dense<0.000000e+00> : vector<8xf32>
    %130 = vector.multi_reduction <add>, %129, %cst_50 [1] : vector<8x8xf32> to vector<8xf32>
    %131 = vector.shape_cast %130 : vector<8xf32> to vector<8x1xf32>
    %132 = tpu.reciprocal %131 {approx = true} : vector<8x1xf32> -> vector<8x1xf32>
    %133 = vector.broadcast %132 : vector<8x1xf32> to vector<8x8xf32>
    %134 = arith.mulf %129, %133 : vector<8x8xf32>
    %cst_51 = arith.constant dense<0.000000e+00> : vector<8x8xf32>
    %135 = tpu.matmul %134, %121, %cst_51 {dimension_numbers = #tpu.dot_dimension_numbers<[1], [0], [0], [1], [0, 0, 1, 1], [], []>} : vector<8x8xf32>, vector<8x8xf32>, vector<8x8xf32> -> vector<8x8xf32>
    %136 = vector.extract_strided_slice %2 {offsets = [8, 0], sizes = [8, 32], strides = [1, 1]} : vector<32x32xf32> to vector<8x32xf32>
    %cst_52 = arith.constant dense<0.000000e+00> : vector<8x32xf32>
    %137 = tpu.matmul %135, %136, %cst_52 {dimension_numbers = #tpu.dot_dimension_numbers<[1], [0], [0], [1], [0, 0, 1, 1], [], []>} : vector<8x8xf32>, vector<8x32xf32>, vector<8x32xf32> -> vector<8x32xf32>
    %138 = arith.addf %118, %137 : vector<8x32xf32>
    %139 = vector.extract_strided_slice %11 {offsets = [8, 16], sizes = [8, 8], strides = [1, 1]} : vector<16x32xf32> to vector<8x8xf32>
    %140 = vector.extract_strided_slice %5 {offsets = [8, 16], sizes = [8, 8], strides = [1, 1]} : vector<16x32xf32> to vector<8x8xf32>
    %141 = vector.extract_strided_slice %9 {offsets = [8, 16], sizes = [8, 8], strides = [1, 1]} : vector<16x32xf32> to vector<8x8xf32>
    %cst_53 = arith.constant dense<0.000000e+00> : vector<8x8xf32>
    %142 = tpu.matmul %139, %140, %cst_53 {dimension_numbers = #tpu.dot_dimension_numbers<[1], [1], [0], [0], [0, 0, 1, 0], [], []>} : vector<8x8xf32>, vector<8x8xf32>, vector<8x8xf32> -> vector<8x8xf32>
    %143 = vector.broadcast %97 : vector<1x8xf32> to vector<8x8xf32>
    %144 = arith.addf %142, %143 : vector<8x8xf32>
    %cst_54 = arith.constant dense<0xFF800000> : vector<8xf32>
    %145 = vector.multi_reduction <maximumf>, %144, %cst_54 [1] : vector<8x8xf32> to vector<8xf32>
    %146 = vector.shape_cast %145 : vector<8xf32> to vector<8x1xf32>
    %147 = vector.broadcast %146 : vector<8x1xf32> to vector<8x8xf32>
    %148 = arith.subf %144, %147 : vector<8x8xf32>
    %149 = math.exp %148 : vector<8x8xf32>
    %cst_55 = arith.constant dense<0.000000e+00> : vector<8xf32>
    %150 = vector.multi_reduction <add>, %149, %cst_55 [1] : vector<8x8xf32> to vector<8xf32>
    %151 = vector.shape_cast %150 : vector<8xf32> to vector<8x1xf32>
    %152 = tpu.reciprocal %151 {approx = true} : vector<8x1xf32> -> vector<8x1xf32>
    %153 = vector.broadcast %152 : vector<8x1xf32> to vector<8x8xf32>
    %154 = arith.mulf %149, %153 : vector<8x8xf32>
    %cst_56 = arith.constant dense<0.000000e+00> : vector<8x8xf32>
    %155 = tpu.matmul %154, %141, %cst_56 {dimension_numbers = #tpu.dot_dimension_numbers<[1], [0], [0], [1], [0, 0, 1, 1], [], []>} : vector<8x8xf32>, vector<8x8xf32>, vector<8x8xf32> -> vector<8x8xf32>
    %156 = vector.extract_strided_slice %2 {offsets = [16, 0], sizes = [8, 32], strides = [1, 1]} : vector<32x32xf32> to vector<8x32xf32>
    %cst_57 = arith.constant dense<0.000000e+00> : vector<8x32xf32>
    %157 = tpu.matmul %155, %156, %cst_57 {dimension_numbers = #tpu.dot_dimension_numbers<[1], [0], [0], [1], [0, 0, 1, 1], [], []>} : vector<8x8xf32>, vector<8x32xf32>, vector<8x32xf32> -> vector<8x32xf32>
    %158 = arith.addf %138, %157 : vector<8x32xf32>
    %159 = vector.extract_strided_slice %11 {offsets = [8, 24], sizes = [8, 8], strides = [1, 1]} : vector<16x32xf32> to vector<8x8xf32>
    %160 = vector.extract_strided_slice %5 {offsets = [8, 24], sizes = [8, 8], strides = [1, 1]} : vector<16x32xf32> to vector<8x8xf32>
    %161 = vector.extract_strided_slice %9 {offsets = [8, 24], sizes = [8, 8], strides = [1, 1]} : vector<16x32xf32> to vector<8x8xf32>
    %cst_58 = arith.constant dense<0.000000e+00> : vector<8x8xf32>
    %162 = tpu.matmul %159, %160, %cst_58 {dimension_numbers = #tpu.dot_dimension_numbers<[1], [1], [0], [0], [0, 0, 1, 0], [], []>} : vector<8x8xf32>, vector<8x8xf32>, vector<8x8xf32> -> vector<8x8xf32>
    %163 = vector.broadcast %97 : vector<1x8xf32> to vector<8x8xf32>
    %164 = arith.addf %162, %163 : vector<8x8xf32>
    %cst_59 = arith.constant dense<0xFF800000> : vector<8xf32>
    %165 = vector.multi_reduction <maximumf>, %164, %cst_59 [1] : vector<8x8xf32> to vector<8xf32>
    %166 = vector.shape_cast %165 : vector<8xf32> to vector<8x1xf32>
    %167 = vector.broadcast %166 : vector<8x1xf32> to vector<8x8xf32>
    %168 = arith.subf %164, %167 : vector<8x8xf32>
    %169 = math.exp %168 : vector<8x8xf32>
    %cst_60 = arith.constant dense<0.000000e+00> : vector<8xf32>
    %170 = vector.multi_reduction <add>, %169, %cst_60 [1] : vector<8x8xf32> to vector<8xf32>
    %171 = vector.shape_cast %170 : vector<8xf32> to vector<8x1xf32>
    %172 = tpu.reciprocal %171 {approx = true} : vector<8x1xf32> -> vector<8x1xf32>
    %173 = vector.broadcast %172 : vector<8x1xf32> to vector<8x8xf32>
    %174 = arith.mulf %169, %173 : vector<8x8xf32>
    %cst_61 = arith.constant dense<0.000000e+00> : vector<8x8xf32>
    %175 = tpu.matmul %174, %161, %cst_61 {dimension_numbers = #tpu.dot_dimension_numbers<[1], [0], [0], [1], [0, 0, 1, 1], [], []>} : vector<8x8xf32>, vector<8x8xf32>, vector<8x8xf32> -> vector<8x8xf32>
    %176 = vector.extract_strided_slice %2 {offsets = [24, 0], sizes = [8, 32], strides = [1, 1]} : vector<32x32xf32> to vector<8x32xf32>
    %cst_62 = arith.constant dense<0.000000e+00> : vector<8x32xf32>
    %177 = tpu.matmul %175, %176, %cst_62 {dimension_numbers = #tpu.dot_dimension_numbers<[1], [0], [0], [1], [0, 0, 1, 1], [], []>} : vector<8x8xf32>, vector<8x32xf32>, vector<8x32xf32> -> vector<8x32xf32>
    %178 = arith.addf %158, %177 : vector<8x32xf32>
    %179 = vector.broadcast %3 : vector<1x32xf32> to vector<8x32xf32>
    %180 = arith.addf %178, %179 : vector<8x32xf32>
    %c8 = arith.constant 8 : index
    %c0_63 = arith.constant 0 : index
    %181 = vector.load %arg8[%c8, %c0_63] : memref<16x32xf32, #tpu.memory_space<vmem>>, vector<8x32xf32>
    tpu.vector_store %arg8[%c8, %c0_63], %180 {strides = array<i32>} : memref<16x32xf32, #tpu.memory_space<vmem>>, vector<8x32xf32>,
    return
  }
}

</mosaic_0001>

<bundles_post_ra>
// kernel: tpu_custom_call.1
= control target key start
LH: loop header
LB: loop body
LE: loop exit
PB: predicated region body
PF: predicated region fallthrough
CT: control target
= control target key end

     0   :  { %13 = vsyncpa [#allocation3], 0  ;;  %s3220_s0 = inlined_call_operand.hbm [shape: f32[16,32], index: 0, kind: input, shape index: {}]   ;;  %s3221_s1 = inlined_call_operand.hbm [shape: f32[16,32], index: 1, kind: input, shape index: {}]   ;;  %s3222_s2 = inlined_call_operand.vmem [shape: f32[2,8], index: 2, kind: input, shape index: {}]   ;;  %s3223_s3 = inlined_call_operand.hbm [shape: f32[32,32], index: 3, kind: input, shape index: {}]   ;;  %s3224_s4 = inlined_call_operand.hbm [shape: f32[32,32], index: 4, kind: input, shape index: {}]   ;;  %s3225_s5 = inlined_call_operand.hbm [shape: f32[32,32], index: 5, kind: input, shape index: {}]   ;;  %s3226_s6 = inlined_call_operand.hbm [shape: f32[32,32], index: 6, kind: input, shape index: {}]   ;;  %s3227_s7 = inlined_call_operand.vmem [shape: f32[1,32], index: 7, kind: input, shape index: {}]   ;;  %s3228_s8 = inlined_call_operand.hbm [shape: f32[16,32], index: 8, kind: output, shape index: {}]  }
   0x1   :  { %14 = vsyncpa [#allocation6], 0 }
   0x2   :  { %15 = vsyncpa [#allocation9], 0 }
   0x3   :  { %16 = vsyncpa [#allocation12], 0 }
   0x4   :  { %17 = vsyncpa [#allocation4], 0  ;;  %s2814_s27 = smov [#allocation5]   ;;  %s2815_s29 = smov [#allocation8]  }
   0x5   :  { %s35_s28 = sshll.u32 %s2814_s27, 4  ;;  %s61_s30 = sshll.u32 %s2815_s29, 4  ;;  %s36_s28 = int_to_ptr.vmem [resolvable:$true] %s35_s28  ;;  %s2873_s30 = int_to_ptr.vmem [resolvable:$true] %s61_s30 }
   0x6   :  { %s2650_s11 = scalar_lea.hbm %s3221_s1, 256 }
   0x7   :  { %p2651_p0 = scmp.ne.s32.totalorder %s3221_s1, %s2650_s11  ;;  %p2654_p1 = scmp.lt.u32.totalorder %s2650_s11, %s3221_s1 }
   0x9   :  { %p2656_p2 = pnand %p2654_p1, %p2651_p0 }
   0xb   :  { %2659 = shalt.err (!%p2656_p2)
}
   0xc   :  { %s2660_s16 = scalar_lea.vmem %s36_s28, 256  ;;  %p2665_p4 = scmp.lt.s32.totalorder %s36_s28, %s36_s28 }
   0xd   :  { %p2661_p3 = scmp.ne.s32.totalorder %s36_s28, %s2660_s16  ;;  %p2666_p5 = scmp.lt.s32.totalorder %s2660_s16, %s2660_s16 }
   0xf   :  { %p2667_p6 = por %p2666_p5, %p2665_p4 }
  0x11   :  { %p2668_p7 = pnand %p2667_p6, %p2661_p3 }
  0x13   :  { %2671 = shalt.err (!%p2668_p7)
}
  0x14   :  { %s2816_s17 = smov 128   ;;  %s2817_s18 = smov 8  }
  0x15   :  { %41 = dma.hbm_to_vmem [thread:$0]  %s3221_s1, 256, %s36_s28, [#allocation6], %s2816_s17, %s2816_s17, %s2817_s18  }
  0x16   :  { %s2672_s23 = scalar_lea.hbm %s3224_s4, 512 }
  0x17   :  { %p2673_p8 = scmp.ne.s32.totalorder %s3224_s4, %s2672_s23  ;;  %p2676_p9 = scmp.lt.u32.totalorder %s2672_s23, %s3224_s4 }
  0x19   :  { %p2678_p10 = pnand %p2676_p9, %p2673_p8 }
  0x1b   :  { %2681 = shalt.err (!%p2678_p10)
}
  0x1c   :  { %s2682_s29 = scalar_lea.vmem %s2873_s30, 512  ;;  %p2687_p12 = scmp.lt.s32.totalorder %s2873_s30, %s2873_s30 }
  0x1d   :  { %p2683_p11 = scmp.ne.s32.totalorder %s2873_s30, %s2682_s29  ;;  %p2688_p13 = scmp.lt.s32.totalorder %s2682_s29, %s2682_s29 }
  0x1f   :  { %p2689_p0 = por %p2688_p13, %p2687_p12 }
  0x21   :  { %p2690_p1 = pnand %p2689_p0, %p2683_p11 }
  0x23   :  { %2693 = shalt.err (!%p2690_p1)
}
  0x24   :  { %67 = dma.hbm_to_vmem [thread:$0]  %s3224_s4, 512, %s2873_s30, [#allocation9], %s2816_s17, %s2816_s17, %s2817_s18  }
  0x25   :  { %s2818_s9 = smov [#allocation2]   ;;  %s2819_s11 = smov [#allocation7]  }
  0x26   :  { %s23_s10 = sshll.u32 %s2818_s9, 4  ;;  %s49_s12 = sshll.u32 %s2819_s11, 4  ;;  %s24_s10 = int_to_ptr.vmem [resolvable:$true] %s23_s10  ;;  %s2910_s12 = int_to_ptr.vmem [resolvable:$true] %s49_s12 }
  0x27   :  { %s2694_s15 = scalar_lea.hbm %s3220_s0, 256 }
  0x28   :  { %p2695_p2 = scmp.ne.s32.totalorder %s3220_s0, %s2694_s15  ;;  %p2698_p3 = scmp.lt.u32.totalorder %s2694_s15, %s3220_s0 }
  0x2a   :  { %p2700_p4 = pnand %p2698_p3, %p2695_p2 }
  0x2c   :  { %2703 = shalt.err (!%p2700_p4)
}
  0x2d   :  { %s2704_s4 = scalar_lea.vmem %s24_s10, 256  ;;  %p2709_p6 = scmp.lt.s32.totalorder %s24_s10, %s24_s10 }
  0x2e   :  { %p2705_p5 = scmp.ne.s32.totalorder %s24_s10, %s2704_s4  ;;  %p2710_p7 = scmp.lt.s32.totalorder %s2704_s4, %s2704_s4 }
  0x30   :  { %p2711_p8 = por %p2710_p7, %p2709_p6 }
  0x32   :  { %p2712_p9 = pnand %p2711_p8, %p2705_p5 }
  0x34   :  { %2715 = shalt.err (!%p2712_p9)
}
  0x35   :  { %29 = dma.hbm_to_vmem [thread:$0]  %s3220_s0, 256, %s24_s10, [#allocation3], %s2816_s17, %s2816_s17, %s2817_s18  }
  0x36   :  { %s2716_s25 = scalar_lea.hbm %s3223_s3, 512 }
  0x37   :  { %p2717_p10 = scmp.ne.s32.totalorder %s3223_s3, %s2716_s25  ;;  %p2720_p11 = scmp.lt.u32.totalorder %s2716_s25, %s3223_s3 }
  0x39   :  { %p2722_p12 = pnand %p2720_p11, %p2717_p10 }
  0x3b   :  { %2725 = shalt.err (!%p2722_p12)
}
  0x3c   :  { %s2726_s28 = scalar_lea.vmem %s2910_s12, 512  ;;  %p2731_p0 = scmp.lt.s32.totalorder %s2910_s12, %s2910_s12 }
  0x3d   :  { %p2727_p13 = scmp.ne.s32.totalorder %s2910_s12, %s2726_s28  ;;  %p2732_p1 = scmp.lt.s32.totalorder %s2726_s28, %s2726_s28 }
  0x3f   :  { %p2733_p2 = por %p2732_p1, %p2731_p0 }
  0x41   :  { %p2734_p3 = pnand %p2733_p2, %p2727_p13 }
  0x43   :  { %2737 = shalt.err (!%p2734_p3)
}
  0x44   :  { %55 = dma.hbm_to_vmem [thread:$0]  %s3223_s3, 512, %s2910_s12, [#allocation6], %s2816_s17, %s2816_s17, %s2817_s18  }
  0x45   :  { %s2820_s10 = smov [#allocation10]   ;;  %s2821_s13 = smov [#allocation11]  }
  0x46   :  { %s73_s11 = sshll.u32 %s2820_s10, 4  ;;  %s85_s14 = sshll.u32 %s2821_s13, 4  ;;  %s74_s11 = int_to_ptr.vmem [resolvable:$true] %s73_s11  ;;  %s2947_s14 = int_to_ptr.vmem [resolvable:$true] %s85_s14 }
  0x47   :  { %s2738_s19 = scalar_lea.hbm %s3225_s5, 512 }
  0x48   :  { %p2739_p4 = scmp.ne.s32.totalorder %s3225_s5, %s2738_s19  ;;  %p2742_p5 = scmp.lt.u32.totalorder %s2738_s19, %s3225_s5 }
  0x4a   :  { %p2744_p6 = pnand %p2742_p5, %p2739_p4 }
  0x4c   :  { %2747 = shalt.err (!%p2744_p6)
}
  0x4d   :  { %s2748_s3 = scalar_lea.vmem %s74_s11, 512  ;;  %p2753_p8 = scmp.lt.s32.totalorder %s74_s11, %s74_s11 }
  0x4e   :  { %p2749_p7 = scmp.ne.s32.totalorder %s74_s11, %s2748_s3  ;;  %p2754_p9 = scmp.lt.s32.totalorder %s2748_s3, %s2748_s3 }
  0x50   :  { %p2755_p10 = por %p2754_p9, %p2753_p8 }
  0x52   :  { %p2756_p11 = pnand %p2755_p10, %p2749_p7 }
  0x54   :  { %2759 = shalt.err (!%p2756_p11)
}
  0x55   :  { %79 = dma.hbm_to_vmem [thread:$0]  %s3225_s5, 512, %s74_s11, [#allocation9], %s2816_s17, %s2816_s17, %s2817_s18  }
  0x56   :  { %s2760_s25 = scalar_lea.hbm %s3226_s6, 512 }
  0x57   :  { %p2761_p12 = scmp.ne.s32.totalorder %s3226_s6, %s2760_s25  ;;  %p2764_p13 = scmp.lt.u32.totalorder %s2760_s25, %s3226_s6 }
  0x59   :  { %p2766_p0 = pnand %p2764_p13, %p2761_p12 }
  0x5b   :  { %2769 = shalt.err (!%p2766_p0)
}
  0x5c   :  { %s2770_s28 = scalar_lea.vmem %s2947_s14, 512  ;;  %p2775_p2 = scmp.lt.s32.totalorder %s2947_s14, %s2947_s14 }
  0x5d   :  { %p2771_p1 = scmp.ne.s32.totalorder %s2947_s14, %s2770_s28  ;;  %p2776_p3 = scmp.lt.s32.totalorder %s2770_s28, %s2770_s28 }
  0x5f   :  { %p2777_p4 = por %p2776_p3, %p2775_p2 }
  0x61   :  { %p2778_p5 = pnand %p2777_p4, %p2771_p1 }
  0x63   :  { %2781 = shalt.err (!%p2778_p5)
}
  0x64   :  { %91 = dma.hbm_to_vmem [thread:$0]  %s3226_s6, 512, %s2947_s14, [#allocation12], %s2816_s17, %s2816_s17, %s2817_s18  }
  0x65   :  { %2804 = dma.done.wait [#allocation3], 256  }
  0x66   :  { %2805 = vsyncadd [#allocation3], 4294967040 }
  0x67   :  { %2806 = dma.done.wait [#allocation6], 768  }
  0x68   :  { %2807 = vsyncadd [#allocation6], 4294966528 }
  0x69   :  { %2808 = dma.done.wait [#allocation9], 1024  }
  0x6a   :  { %2809 = vsyncadd [#allocation9], 4294966272 }
  0x6b   :  { %2810 = dma.done.wait [#allocation12], 512  }
  0x6c   :  { %2811 = vsyncadd [#allocation12], 4294966784  ;;  %v121_v0 = vld [vmem:[#allocation7] sm:$0xff]  ;;  %v122_v1 = vld [vmem:[#allocation7 + $0x8] sm:$0xff]  ;;  %vm125_vm0 = vcmask 261120   ;;  %v2822_v22 = vmov 0.0  }
  0x6d   :  { %v207_v2 = vld [vmem:[#allocation8] sm:$0xff]  ;;  %v2580_v3 = vpack.c.bf16 %v122_v1, %v121_v0  ;;  %v208_v4 = vld [vmem:[#allocation8 + $0x8] sm:$0xff]  ;;  %v123_v5 = vld [vmem:[#allocation7 + $0x10] sm:$0xff]  ;;  %vm2823_vm1 = vmmov 0   ;;  %vm384_vm2 = vcmask 64512   ;;  %s2824_s6 = smov 120  }
  0x6e   :  { %v124_v6 = vld [vmem:[#allocation7 + $0x18] sm:$0xff]  ;;  %v2588_v7 = vpack.c.bf16 %v208_v4, %v207_v2  ;;  %v209_v9 = vld [vmem:[#allocation8 + $0x10] sm:$0xff]  ;;  %v112_v11 = vld [vmem:[#allocation2] sm:$0xff]  ;;  %s2825_s11 = smov 112   ;;  %s2826_s13 = smov 104  }
  0x6f   :  { %v2584_v8 = vpack.c.bf16 %v124_v6, %v123_v5  ;;  %v210_v10 = vld [vmem:[#allocation8 + $0x18] sm:$0xff]  ;;  %2581 = vmatprep.subr.bf16.mxu0 %v2580_v3  ;;  %2435 = vmatprep.mubr.msk.f32.mxu0 %vm125_vm0, %v112_v11  ;;  %v114_v13 = vld [vmem:[#allocation5] sm:$0xff]  ;;  %v292_v14 = vld [vmem:[#allocation10] sm:$0xff] }
  0x70   :  { %v2592_v12 = vpack.c.bf16 %v210_v10, %v209_v9  ;;  %2589 = vmatprep.subr.bf16.mxu1 %v2588_v7  ;;  %2583 = vmatpush3.bf16.msra.mxu0 %v2580_v3  ;;  %v293_v15 = vld [vmem:[#allocation10 + $0x8] sm:$0xff]  ;;  %v294_v17 = vld [vmem:[#allocation10 + $0x10] sm:$0xff]  ;;  %v295_v18 = vld [vmem:[#allocation10 + $0x18] sm:$0xff] }
  0x71   :  { %2591 = vmatpush3.bf16.msra.mxu1 %v2588_v7  ;;  %2585 = vmatprep.subr.bf16.mxu0 %v2584_v8  ;;  %v2596_v16 = vpack.c.bf16 %v293_v15, %v292_v14  ;;  %v113_v19 = vld [vmem:[#allocation2 + $0x8] sm:$0xff]  ;;  %v115_v20 = vld [vmem:[#allocation5 + $0x8] sm:$0xff]  ;;  %v2600_v21 = vpack.c.bf16 %v295_v18, %v294_v17  ;;  %v3020_v30 = vld [vmem:[%s3222_s2] ss:$0 sm:$0xff] }
  0x72   :  { %2593 = vmatprep.subr.bf16.mxu1 %v2592_v12  ;;  %2446 = vmatprep.mubr.msk.f32.mxu1 %vm125_vm0, %v114_v13  ;;  %v3045_v54 = vld [vmem:[#allocation11 + $0x8] sm:$0xff]  ;;  %v3050_v59 = vld [vmem:[#allocation11] sm:$0xff]  ;;  %v3078_v17 = vld [vmem:[#allocation11 + $0x10] sm:$0xff] }
  0x74   :  { %2587 = vmatpush3.bf16.msra.mxu0 %v2584_v8 }
  0x75   :  { %2595 = vmatpush3.bf16.msra.mxu1 %v2592_v12  ;;  %2597 = vmatprep.subr.bf16.mxu0 %v2596_v16 }
  0x76   :  { %2460 = vmatprep.subr.mxu1 %v2822_v22 }
  0x77   :  { %2436 = vmatmul.mubr.msk.f32.vlgmr.msra.gmra.mrb[0].mxu0 %vm125_vm0, %v113_v19 }
  0x78   :  { %2447 = vmatmul.mubr.msk.f32.vlgmr.msra.gmra.mrb[0].mxu1 %vm125_vm0, %v115_v20  ;;  %2599 = vmatpush3.bf16.msra.mxu0 %v2596_v16 }
  0x79   :  { %2601 = vmatprep.subr.bf16.mxu0 %v2600_v21  ;;  %2462 = vmatprep.mubr.msk.f32.mxu1 %vm2823_vm1, %v2822_v22 }
  0x7c   :  { %2603 = vmatpush3.bf16.msra.mxu0 %v2600_v21 }
  0x7d   :  { %2470 = vmatprep.subr.mxu0 %v2822_v22 }
 0x14a   :  { %v2992_v23 = vpop.f32.mrb[0].mxu0 }
 0x14b   :  { %v2994_v24 = vpop.f32.mrb[0].mxu1  ;;  %v198_v25 = vpop.f32.mrb[1].mxu0 }
 0x14c   :  { %v283_v26 = vpop.f32.mrb[1].mxu1  ;;  %547 = vrot.lane.b32.xlu0 %v198_v25, %s2824_s6  ;;  %2461 = vmatpush3.xpose.msk.msra.mxu1 %vm384_vm2, %v198_v25 }
 0x14d   :  { %v2998_v27 = vmul.f32 0.17677669, %v283_v26  ;;  %2457 = vmatprep.mubr.msk.f32.mxu0 %vm125_vm0, %v283_v26  ;;  %2465 = vmatprep.subr.mxu1 %v2822_v22 }
 0x14e   :  { %2458 = vmatmul.mubr.msk.f32.vlgmr.msra.gmra.mrb[2].mxu0 %vm125_vm0, %v2994_v24 }
 0x14f   :  { %2463 = vmatmul.mubr.msk.f32.vlgmr.msra.gmra.mrb[2].mxu1 %vm384_vm2, %v2998_v27  ;;  %2472 = vmatprep.mubr.msk.f32.mxu0 %vm2823_vm1, %v2822_v22 }
 0x150   :  { %545 = vrot.lane.b32.xlu0 %v2998_v27, %s2824_s6  ;;  %2467 = vmatprep.mubr.msk.f32.mxu1 %vm2823_vm1, %v2822_v22 }
 0x1be   :  { %v548_v28 = vpop.permute.xlu0 %547 }
 0x1bf   :  { %2471 = vmatpush3.xpose.msk.msra.mxu0 %vm384_vm2, %v548_v28 }
 0x1c0   :  { %2480 = vmatprep.subr.mxu0 %v2822_v22 }
 0x1c2   :  { %v546_v29 = vpop.permute.xlu0 %545 }
 0x1c3   :  { %2473 = vmatmul.mubr.msk.f32.vlgmr.msra.gmra.mrb[4].mxu0 %vm384_vm2, %v546_v29 }
 0x1c4   :  { %2482 = vmatprep.mubr.msk.f32.mxu0 %vm2823_vm1, %v2822_v22  ;;  %2481 = vmatpush3.msra.mxu0 %v3045_v54 }
 0x1c5   :  { %2490 = vmatprep.subr.mxu0 %v2822_v22 }
 0x221   :  { %v3022_v31 = vpop.f32.mrb[2].mxu0 }
 0x222   :  { %v3024_v32 = vpop.f32.mrb[3].mxu0  ;;  %v457_v33 = vpop.f32.mrb[2].mxu1 }
 0x223   :  { %v458_v34 = vadd.f32 %v3020_v30, %v457_v33  ;;  %2466 = vmatpush3.msra.mxu1 %v3024_v32  ;;  %v2464_v35 = vpop.f32.mrb[3].mxu1 }
 0x224   :  { %2475 = vmatprep.subr.mxu1 %v2822_v22 }
 0x225   :  { %v461_v36 = vsel %vm384_vm2, %v458_v34, -inf }
 0x226   :  { %462 = vmax.xlane.f32.xlu1 %v461_v36 }
 0x296   :  { %v619_v37 = vpop.f32.mrb[4].mxu0 }
 0x297   :  { %v620_v38 = vadd.f32 %v3020_v30, %v619_v37  ;;  %v2474_v39 = vpop.f32.mrb[5].mxu0 }
 0x299   :  { %v623_v40 = vsel %vm384_vm2, %v620_v38, -inf }
 0x29a   :  { %624 = vmax.xlane.f32.xlu1 %v623_v40  ;;  %v3098_v40 = vmul.f32 0.17677669, %v2994_v24 }
 0x2b3   :  { %v463_v41 = vpop.xlane.xlu1 %462 }
 0x2b4   :  { %v464_v42 = vsub.f32 %v458_v34, %v463_v41  ;;  %v3102_v41 = vld [vmem:[#allocation11 + $0x18] sm:$0xff] }
 0x2b6   :  { %v465_v43 = vmul.f32 1.442695, %v464_v42 }
 0x2b8   :  { %2618 = vpow2.f32 %v465_v43 }
 0x2c2   :  { %v2619_v44 = vpop.eup %2618 }
 0x2c3   :  { %v467_v45 = vsel %vm384_vm2, %v2619_v44, 0.0 }
 0x2c4   :  { %468 = vadd.xlane.f32.xlu0 %v467_v45 }
 0x2da   :  { %946 = vrot.lane.b32.xlu0 %v3024_v32, %s2825_s11 }
 0x2de   :  { %1098 = vrot.lane.b32.xlu0 %v198_v25, %s2826_s13 }
 0x327   :  { %v625_v46 = vpop.xlane.xlu1 %624 }
 0x328   :  { %v626_v47 = vsub.f32 %v620_v38, %v625_v46 }
 0x32a   :  { %v627_v48 = vmul.f32 1.442695, %v626_v47 }
 0x32c   :  { %2620 = vpow2.f32 %v627_v48 }
 0x336   :  { %v2621_v49 = vpop.eup %2620 }
 0x337   :  { %v629_v50 = vsel %vm384_vm2, %v2621_v49, 0.0 }
 0x338   :  { %630 = vadd.xlane.f32.xlu1 %v629_v50  ;;  %v3128_v50 = vld [vmem:[%s3222_s2 + $0x1] ss:$0 sm:$0xff] }
 0x349   :  { %635 = vrot.lane.b32.xlu1 %v3024_v32, %s2824_s6 }
 0x34d   :  { %859 = vrot.lane.b32.xlu1 %v198_v25, %s2825_s11 }
 0x351   :  { %v469_v51 = vpop.xlane.xlu0 %468  ;;  %857 = vrot.lane.b32.xlu1 %v2998_v27, %s2825_s11 }
 0x352   :  { %2622 = vrcp.f32 %v469_v51 }
 0x355   :  { %v947_v61 = vpop.permute.xlu0 %946 }
 0x359   :  { %v1099_v18 = vpop.permute.xlu0 %1098 }
 0x35c   :  { %v2623_v52 = vpop.eup %2622 }
 0x35d   :  { %v471_v53 = vmul.f32 %v2623_v52, %v2619_v44 }
 0x35f   :  { %2468 = vmatmul.mubr.msk.f32.vlgmr.msra.gmra.mrb[4].mxu1 %vm384_vm2, %v471_v53 }
 0x360   :  { %2477 = vmatprep.mubr.msk.f32.mxu1 %vm2823_vm1, %v2822_v22 }
 0x3c5   :  { %v631_v55 = vpop.xlane.xlu1 %630 }
 0x3c6   :  { %2624 = vrcp.f32 %v631_v55 }
 0x3c9   :  { %v636_v56 = vpop.permute.xlu1 %635 }
 0x3ca   :  { %2476 = vmatpush3.msra.mxu1 %v636_v56 }
 0x3cb   :  { %2485 = vmatprep.subr.mxu1 %v2822_v22 }
 0x3cd   :  { %v860_v63 = vpop.permute.xlu1 %859 }
 0x3d0   :  { %v2625_v57 = vpop.eup %2624 }
 0x3d1   :  { %v633_v58 = vmul.f32 %v2625_v57, %v2621_v49  ;;  %v858_v2 = vpop.permute.xlu1 %857 }
 0x3d3   :  { %2478 = vmatmul.mubr.msk.f32.vlgmr.msra.gmra.mrb[6].mxu1 %vm384_vm2, %v633_v58 }
 0x3d4   :  { %2486 = vmatpush3.msra.mxu1 %v3050_v59  ;;  %2487 = vmatprep.mubr.msk.f32.mxu1 %vm2823_vm1, %v2822_v22 }
 0x3d5   :  { %2495 = vmatprep.subr.mxu1 %v2822_v22 }
 0x432   :  { %v541_v60 = vpop.f32.mrb[4].mxu1 }
 0x433   :  { %v2469_v62 = vpop.f32.mrb[5].mxu1  ;;  %2488 = vmatmul.mubr.msk.f32.vlgmr.msra.gmra.mrb[8].mxu1 %vm384_vm2, %v541_v60 }
 0x434   :  { %2496 = vmatpush3.msra.mxu1 %v947_v61  ;;  %2497 = vmatprep.mubr.msk.f32.mxu1 %vm2823_vm1, %v2822_v22 }
 0x435   :  { %2505 = vmatprep.subr.mxu1 %v2822_v22 }
 0x4a6   :  { %v707_v0 = vpop.f32.mrb[6].mxu1 }
 0x4a7   :  { %v2479_v1 = vpop.f32.mrb[7].mxu1  ;;  %2483 = vmatmul.mubr.msk.f32.vlgmr.msra.gmra.mrb[6].mxu0 %vm384_vm2, %v707_v0 }
 0x4a8   :  { %2491 = vmatpush3.xpose.msk.msra.mxu0 %vm384_vm2, %v860_v63  ;;  %2492 = vmatprep.mubr.msk.f32.mxu0 %vm2823_vm1, %v2822_v22 }
 0x4a9   :  { %2500 = vmatprep.subr.mxu0 %v2822_v22 }
 0x4ab   :  { %2493 = vmatmul.mubr.msk.f32.vlgmr.msra.gmra.mrb[8].mxu0 %vm384_vm2, %v858_v2 }
 0x4ac   :  { %2502 = vmatprep.mubr.msk.f32.mxu0 %vm2823_vm1, %v2822_v22  ;;  %2501 = vmatpush3.msra.mxu0 %v3078_v17 }
 0x4ad   :  { %2510 = vmatprep.subr.mxu0 %v2822_v22 }
 0x506   :  { %v853_v3 = vpop.f32.mrb[8].mxu1 }
 0x507   :  { %v2489_v4 = vpop.f32.mrb[9].mxu1 }
 0x57a   :  { %v780_v5 = vpop.f32.mrb[6].mxu0 }
 0x57b   :  { %v854_v6 = vadd.f32 %v853_v3, %v780_v5  ;;  %v2484_v7 = vpop.f32.mrb[7].mxu0 }
 0x57e   :  { %v931_v8 = vpop.f32.mrb[8].mxu0 }
 0x57f   :  { %v932_v9 = vadd.f32 %v3020_v30, %v931_v8  ;;  %v2494_v10 = vpop.f32.mrb[9].mxu0 }
 0x581   :  { %v935_v11 = vsel %vm384_vm2, %v932_v9, -inf }
 0x582   :  { %936 = vmax.xlane.f32.xlu1 %v935_v11 }
 0x593   :  { %1185 = vrot.lane.b32.xlu1 %v3024_v32, %s2826_s13 }
 0x597   :  { %1510 = vrot.lane.b32.xlu1 %v2992_v23, %s2824_s6 }
 0x60f   :  { %v937_v12 = vpop.xlane.xlu1 %936 }
 0x610   :  { %v938_v13 = vsub.f32 %v932_v9, %v937_v12 }
 0x612   :  { %v939_v14 = vmul.f32 1.442695, %v938_v13 }
 0x614   :  { %2626 = vpow2.f32 %v939_v14 }
 0x61e   :  { %v2627_v15 = vpop.eup %2626 }
 0x61f   :  { %v941_v16 = vsel %vm384_vm2, %v2627_v15, 0.0 }
 0x620   :  { %942 = vadd.xlane.f32.xlu0 %v941_v16 }
 0x636   :  { %1096 = vrot.lane.b32.xlu0 %v2998_v27, %s2826_s13  ;;  %v1186_v27 = vpop.permute.xlu1 %1185 }
 0x63a   :  { %v1511_v44 = vpop.permute.xlu1 %1510 }
 0x6ad   :  { %v943_v19 = vpop.xlane.xlu0 %942 }
 0x6ae   :  { %2628 = vrcp.f32 %v943_v19 }
 0x6b1   :  { %v1097_v25 = vpop.permute.xlu0 %1096 }
 0x6b8   :  { %v2629_v20 = vpop.eup %2628 }
 0x6b9   :  { %v945_v21 = vmul.f32 %v2629_v20, %v2627_v15 }
 0x6bb   :  { %2498 = vmatmul.mubr.msk.f32.vlgmr.msra.gmra.mrb[10].mxu1 %vm384_vm2, %v945_v21 }
 0x6bc   :  { %2506 = vmatpush3.xpose.msk.msra.mxu1 %vm384_vm2, %v1099_v18  ;;  %2507 = vmatprep.mubr.msk.f32.mxu1 %vm2823_vm1, %v2822_v22 }
 0x6bd   :  { %2515 = vmatprep.subr.mxu1 %v2822_v22 }
 0x6bf   :  { %2508 = vmatmul.mubr.msk.f32.vlgmr.msra.gmra.mrb[12].mxu1 %vm384_vm2, %v1097_v25 }
 0x6c0   :  { %2517 = vmatprep.mubr.msk.f32.mxu1 %vm2823_vm1, %v2822_v22  ;;  %2516 = vmatpush3.msra.mxu1 %v3102_v41 }
 0x6c1   :  { %2525 = vmatprep.subr.mxu1 %v2822_v22 }
 0x78e   :  { %v1018_v26 = vpop.f32.mrb[10].mxu1 }
 0x78f   :  { %v2499_v28 = vpop.f32.mrb[11].mxu1  ;;  %2503 = vmatmul.mubr.msk.f32.vlgmr.msra.gmra.mrb[10].mxu0 %vm384_vm2, %v1018_v26 }
 0x790   :  { %2511 = vmatpush3.msra.mxu0 %v1186_v27  ;;  %2512 = vmatprep.mubr.msk.f32.mxu0 %vm2823_vm1, %v2822_v22 }
 0x791   :  { %2520 = vmatprep.subr.mxu0 %v2822_v22 }
 0x792   :  { %v1170_v29 = vpop.f32.mrb[12].mxu1 }
 0x793   :  { %v1171_v32 = vadd.f32 %v3020_v30, %v1170_v29  ;;  %v2509_v33 = vpop.f32.mrb[13].mxu1 }
 0x795   :  { %v1174_v34 = vsel %vm384_vm2, %v1171_v32, -inf }
 0x796   :  { %1175 = vmax.xlane.f32.xlu0 %v1174_v34 }
 0x823   :  { %v1176_v35 = vpop.xlane.xlu0 %1175 }
 0x824   :  { %v1177_v36 = vsub.f32 %v1171_v32, %v1176_v35 }
 0x826   :  { %v1178_v37 = vmul.f32 1.442695, %v1177_v36 }
 0x828   :  { %2630 = vpow2.f32 %v1178_v37 }
 0x832   :  { %v2631_v38 = vpop.eup %2630 }
 0x833   :  { %v1180_v39 = vsel %vm384_vm2, %v2631_v38, 0.0 }
 0x834   :  { %1181 = vadd.xlane.f32.xlu1 %v1180_v39 }
 0x845   :  { %1508 = vrot.lane.b32.xlu1 %v3098_v40, %s2824_s6 }
 0x862   :  { %v1091_v30 = vpop.f32.mrb[10].mxu0 }
 0x863   :  { %v1095_v42 = vadd.f32 %v1091_v30, %v854_v6  ;;  %v2504_v43 = vpop.f32.mrb[11].mxu0  ;;  %v3148_v6 = vld [vmem:[%s3227_s7] ss:$0 sm:$0xff]  ;;  %s2827_s7 = smov [#allocation13]  }
 0x864   :  { %s2305_s19 = sshll.u32 %s2827_s7, 4  ;;  %s2306_s19 = int_to_ptr.vmem [resolvable:$true] %s2305_s19 }
 0x865   :  { %s2782_s20 = scalar_lea.vmem %s2306_s19, 256  ;;  %p2787_p7 = scmp.lt.s32.totalorder %s2306_s19, %s2306_s19 }
 0x866   :  { %p2783_p6 = scmp.ne.s32.totalorder %s2306_s19, %s2782_s20  ;;  %p2788_p8 = scmp.lt.s32.totalorder %s2782_s20, %s2782_s20 }
 0x868   :  { %p2789_p9 = por %p2788_p8, %p2787_p7 }
 0x86a   :  { %p2790_p10 = pnand %p2789_p9, %p2783_p6 }
 0x8c1   :  { %v1182_v45 = vpop.xlane.xlu1 %1181 }
 0x8c2   :  { %2632 = vrcp.f32 %v1182_v45 }
 0x8c5   :  { %v1509_v24 = vpop.permute.xlu1 %1508 }
 0x8cc   :  { %v2633_v46 = vpop.eup %2632 }
 0x8cd   :  { %v1184_v47 = vmul.f32 %v2633_v46, %v2631_v38 }
 0x8cf   :  { %2513 = vmatmul.mubr.msk.f32.vlgmr.msra.gmra.mrb[12].mxu0 %vm384_vm2, %v1184_v47 }
 0x8d0   :  { %2521 = vmatpush3.xpose.msk.msra.mxu0 %vm384_vm2, %v2992_v23  ;;  %2522 = vmatprep.mubr.msk.f32.mxu0 %vm2823_vm1, %v2822_v22 }
 0x8d1   :  { %2530 = vmatprep.subr.mxu0 %v2822_v22 }
 0x8d3   :  { %2523 = vmatmul.mubr.msk.f32.vlgmr.msra.gmra.mrb[14].mxu0 %vm384_vm2, %v3098_v40 }
 0x8d4   :  { %2531 = vmatpush3.xpose.msk.msra.mxu0 %vm384_vm2, %v1511_v44  ;;  %2532 = vmatprep.mubr.msk.f32.mxu0 %vm2823_vm1, %v2822_v22 }
 0x8d5   :  { %2540 = vmatprep.subr.mxu0 %v2822_v22 }
 0x8d7   :  { %2533 = vmatmul.mubr.msk.f32.vlgmr.msra.gmra.mrb[16].mxu0 %vm384_vm2, %v1509_v24 }
 0x8d8   :  { %2541 = vmatpush3.msra.mxu0 %v3045_v54  ;;  %2542 = vmatprep.mubr.msk.f32.mxu0 %vm2823_vm1, %v2822_v22 }
 0x8d9   :  { %2550 = vmatprep.subr.mxu0 %v2822_v22 }
 0x9a2   :  { %v1257_v48 = vpop.f32.mrb[12].mxu0 }
 0x9a3   :  { %v2514_v49 = vpop.f32.mrb[13].mxu0  ;;  %2518 = vmatmul.mubr.msk.f32.vlgmr.msra.gmra.mrb[14].mxu1 %vm384_vm2, %v1257_v48 }
 0x9a4   :  { %2526 = vmatpush3.msra.mxu1 %v3022_v31  ;;  %2527 = vmatprep.mubr.msk.f32.mxu1 %vm2823_vm1, %v2822_v22 }
 0x9a5   :  { %2535 = vmatprep.subr.mxu1 %v2822_v22 }
 0x9a6   :  { %v1420_v51 = vpop.f32.mrb[14].mxu0 }
 0x9a7   :  { %v1421_v52 = vadd.f32 %v3128_v50, %v1420_v51  ;;  %v2524_v53 = vpop.f32.mrb[15].mxu0 }
 0x9a9   :  { %v1424_v54 = vsel %vm384_vm2, %v1421_v52, -inf }
 0x9aa   :  { %1425 = vmax.xlane.f32.xlu1 %v1424_v54  ;;  %v1582_v55 = vpop.f32.mrb[16].mxu0 }
 0x9ab   :  { %v1583_v56 = vadd.f32 %v3128_v50, %v1582_v55  ;;  %v2534_v57 = vpop.f32.mrb[17].mxu0 }
 0x9ad   :  { %v1586_v58 = vsel %vm384_vm2, %v1583_v56, -inf }
 0x9ae   :  { %1587 = vmax.xlane.f32.xlu0 %v1586_v58 }
 0x9bb   :  { %1820 = vrot.lane.b32.xlu1 %v3098_v40, %s2825_s11 }
 0xa37   :  { %v1426_v60 = vpop.xlane.xlu1 %1425 }
 0xa38   :  { %v1427_v61 = vsub.f32 %v1421_v52, %v1426_v60 }
 0xa3a   :  { %v1428_v62 = vmul.f32 1.442695, %v1427_v61 }
 0xa3b   :  { %v1588_v63 = vpop.xlane.xlu0 %1587 }
 0xa3c   :  { %2634 = vpow2.f32 %v1428_v62  ;;  %v1589_v0 = vsub.f32 %v1583_v56, %v1588_v63 }
 0xa3e   :  { %v1590_v1 = vmul.f32 1.442695, %v1589_v0 }
 0xa40   :  { %2636 = vpow2.f32 %v1590_v1 }
 0xa46   :  { %v2635_v2 = vpop.eup %2634 }
 0xa47   :  { %v1430_v3 = vsel %vm384_vm2, %v2635_v2, 0.0 }
 0xa48   :  { %1431 = vadd.xlane.f32.xlu0 %v1430_v3 }
 0xa4a   :  { %v2637_v4 = vpop.eup %2636 }
 0xa4b   :  { %v1592_v5 = vsel %vm384_vm2, %v2637_v4, 0.0 }
 0xa4c   :  { %1593 = vadd.xlane.f32.xlu0 %v1592_v5 }
 0xa62   :  { %1598 = vrot.lane.b32.xlu0 %v3022_v31, %s2824_s6 }
 0xa66   :  { %1822 = vrot.lane.b32.xlu0 %v2992_v23, %s2825_s11 }
 0xa76   :  { %v1330_v7 = vpop.f32.mrb[14].mxu1 }
 0xa77   :  { %v1334_v8 = vadd.f32 %v1330_v7, %v1095_v42  ;;  %v2519_v9 = vpop.f32.mrb[15].mxu1 }
 0xa79   :  { %v1341_v10 = vadd.f32 %v3148_v6, %v1334_v8 }
 0xa7b   :  { %1342 = vst.msk [vmem:[#allocation13] sm:$0xff] %vm125_vm0, %v1341_v10 }
 0xad5   :  { %v1432_v11 = vpop.xlane.xlu0 %1431 }
 0xad6   :  { %2638 = vrcp.f32 %v1432_v11 }
 0xad9   :  { %v1594_v12 = vpop.xlane.xlu0 %1593 }
 0xada   :  { %2640 = vrcp.f32 %v1594_v12 }
 0xadd   :  { %v1599_v15 = vpop.permute.xlu0 %1598 }
 0xae0   :  { %v2639_v13 = vpop.eup %2638 }
 0xae1   :  { %v1434_v14 = vmul.f32 %v2639_v13, %v2635_v2  ;;  %v1823_v25 = vpop.permute.xlu0 %1822 }
 0xae3   :  { %2528 = vmatmul.mubr.msk.f32.vlgmr.msra.gmra.mrb[16].mxu1 %vm384_vm2, %v1434_v14 }
 0xae4   :  { %v2641_v16 = vpop.eup %2640  ;;  %2536 = vmatpush3.msra.mxu1 %v1599_v15  ;;  %2537 = vmatprep.mubr.msk.f32.mxu1 %vm2823_vm1, %v2822_v22 }
 0xae5   :  { %v1596_v18 = vmul.f32 %v2641_v16, %v2637_v4  ;;  %2545 = vmatprep.subr.mxu1 %v2822_v22 }
 0xae7   :  { %2538 = vmatmul.mubr.msk.f32.vlgmr.msra.gmra.mrb[18].mxu1 %vm384_vm2, %v1596_v18 }
 0xae8   :  { %2546 = vmatpush3.msra.mxu1 %v3050_v59  ;;  %2547 = vmatprep.mubr.msk.f32.mxu1 %vm2823_vm1, %v2822_v22  ;;  %v1821_v59 = vpop.permute.xlu1 %1820 }
 0xae9   :  { %2555 = vmatprep.subr.mxu1 %v2822_v22 }
 0xbb6   :  { %v1504_v19 = vpop.f32.mrb[16].mxu1 }
 0xbb7   :  { %v2529_v20 = vpop.f32.mrb[17].mxu1  ;;  %2548 = vmatmul.mubr.msk.f32.vlgmr.msra.gmra.mrb[20].mxu1 %vm384_vm2, %v1504_v19 }
 0xbb8   :  { %2557 = vmatprep.mubr.msk.f32.mxu1 %vm2823_vm1, %v2822_v22 }
 0xbba   :  { %v1670_v21 = vpop.f32.mrb[18].mxu1 }
 0xbbb   :  { %v2539_v26 = vpop.f32.mrb[19].mxu1  ;;  %2543 = vmatmul.mubr.msk.f32.vlgmr.msra.gmra.mrb[18].mxu0 %vm384_vm2, %v1670_v21 }
 0xbbc   :  { %2551 = vmatpush3.xpose.msk.msra.mxu0 %vm384_vm2, %v1823_v25  ;;  %2552 = vmatprep.mubr.msk.f32.mxu0 %vm2823_vm1, %v2822_v22 }
 0xbbd   :  { %2560 = vmatprep.subr.mxu0 %v2822_v22 }
 0xbbf   :  { %2553 = vmatmul.mubr.msk.f32.vlgmr.msra.gmra.mrb[20].mxu0 %vm384_vm2, %v1821_v59 }
 0xbc0   :  { %2561 = vmatpush3.msra.mxu0 %v3078_v17  ;;  %2562 = vmatprep.mubr.msk.f32.mxu0 %vm2823_vm1, %v2822_v22 }
 0xbc1   :  { %2570 = vmatprep.subr.mxu0 %v2822_v22 }
 0xc8a   :  { %v1816_v27 = vpop.f32.mrb[20].mxu1 }
 0xc8b   :  { %v2549_v28 = vpop.f32.mrb[21].mxu1 }
 0xc8e   :  { %v1743_v29 = vpop.f32.mrb[18].mxu0 }
 0xc8f   :  { %v1817_v32 = vadd.f32 %v1816_v27, %v1743_v29  ;;  %v2544_v33 = vpop.f32.mrb[19].mxu0 }
 0xc92   :  { %v1894_v34 = vpop.f32.mrb[20].mxu0 }
 0xc93   :  { %v1895_v35 = vadd.f32 %v3128_v50, %v1894_v34  ;;  %v2554_v36 = vpop.f32.mrb[21].mxu0 }
 0xc95   :  { %v1898_v37 = vsel %vm384_vm2, %v1895_v35, -inf }
 0xc96   :  { %1899 = vmax.xlane.f32.xlu0 %v1898_v37 }
 0xcac   :  { %1909 = vrot.lane.b32.xlu0 %v3022_v31, %s2825_s11 }
 0xcb0   :  { %2059 = vrot.lane.b32.xlu0 %v3098_v40, %s2826_s13 }
 0xd23   :  { %v1900_v17 = vpop.xlane.xlu0 %1899 }
 0xd24   :  { %v1901_v38 = vsub.f32 %v1895_v35, %v1900_v17 }
 0xd26   :  { %v1902_v39 = vmul.f32 1.442695, %v1901_v38 }
 0xd27   :  { %v1910_v30 = vpop.permute.xlu0 %1909 }
 0xd28   :  { %2642 = vpow2.f32 %v1902_v39  ;;  %2556 = vmatpush3.msra.mxu1 %v1910_v30 }
 0xd29   :  { %2565 = vmatprep.subr.mxu1 %v2822_v22 }
 0xd2b   :  { %v2060_v47 = vpop.permute.xlu0 %2059 }
 0xd32   :  { %v2643_v42 = vpop.eup %2642 }
 0xd33   :  { %v1904_v43 = vsel %vm384_vm2, %v2643_v42, 0.0 }
 0xd34   :  { %1905 = vadd.xlane.f32.xlu1 %v1904_v43 }
 0xd45   :  { %2061 = vrot.lane.b32.xlu1 %v2992_v23, %s2826_s13 }
 0xdc1   :  { %v1906_v44 = vpop.xlane.xlu1 %1905 }
 0xdc2   :  { %2644 = vrcp.f32 %v1906_v44 }
 0xdc5   :  { %v2062_v40 = vpop.permute.xlu1 %2061 }
 0xdcc   :  { %v2645_v45 = vpop.eup %2644 }
 0xdcd   :  { %v1908_v46 = vmul.f32 %v2645_v45, %v2643_v42 }
 0xdcf   :  { %2558 = vmatmul.mubr.msk.f32.vlgmr.msra.gmra.mrb[22].mxu1 %vm384_vm2, %v1908_v46 }
 0xdd0   :  { %2566 = vmatpush3.xpose.msk.msra.mxu1 %vm384_vm2, %v2062_v40  ;;  %2567 = vmatprep.mubr.msk.f32.mxu1 %vm2823_vm1, %v2822_v22 }
 0xdd1   :  { %2575 = vmatprep.subr.mxu1 %v2822_v22 }
 0xdd3   :  { %2568 = vmatmul.mubr.msk.f32.vlgmr.msra.gmra.mrb[24].mxu1 %vm384_vm2, %v2060_v47 }
 0xdd4   :  { %2576 = vmatpush3.msra.mxu1 %v3102_v41  ;;  %2577 = vmatprep.mubr.msk.f32.mxu1 %vm2823_vm1, %v2822_v22 }
 0xea2   :  { %v1981_v23 = vpop.f32.mrb[22].mxu1 }
 0xea3   :  { %v2559_v24 = vpop.f32.mrb[23].mxu1  ;;  %2563 = vmatmul.mubr.msk.f32.vlgmr.msra.gmra.mrb[22].mxu0 %vm384_vm2, %v1981_v23 }
 0xea4   :  { %2572 = vmatprep.mubr.msk.f32.mxu0 %vm2823_vm1, %v2822_v22 }
 0xea6   :  { %v2133_v48 = vpop.f32.mrb[24].mxu1 }
 0xea7   :  { %v2134_v49 = vadd.f32 %v3128_v50, %v2133_v48  ;;  %v2569_v51 = vpop.f32.mrb[25].mxu1 }
 0xea9   :  { %v2137_v52 = vsel %vm384_vm2, %v2134_v49, -inf }
 0xeaa   :  { %2138 = vmax.xlane.f32.xlu0 %v2137_v52 }
 0xec0   :  { %2148 = vrot.lane.b32.xlu0 %v3022_v31, %s2826_s13 }
 0xf37   :  { %v2139_v41 = vpop.xlane.xlu0 %2138 }
 0xf38   :  { %v2140_v53 = vsub.f32 %v2134_v49, %v2139_v41 }
 0xf3a   :  { %v2141_v54 = vmul.f32 1.442695, %v2140_v53 }
 0xf3b   :  { %v2149_v55 = vpop.permute.xlu0 %2148 }
 0xf3c   :  { %2646 = vpow2.f32 %v2141_v54  ;;  %2571 = vmatpush3.msra.mxu0 %v2149_v55 }
 0xf46   :  { %v2647_v56 = vpop.eup %2646 }
 0xf47   :  { %v2143_v57 = vsel %vm384_vm2, %v2647_v56, 0.0 }
 0xf48   :  { %2144 = vadd.xlane.f32.xlu1 %v2143_v57 }
 0xf76   :  { %v2054_v22 = vpop.f32.mrb[22].mxu0 }
 0xf77   :  { %v2058_v58 = vadd.f32 %v2054_v22, %v1817_v32  ;;  %v2564_v50 = vpop.f32.mrb[23].mxu0 }
 0xfd5   :  { %v2145_v60 = vpop.xlane.xlu1 %2144 }
 0xfd6   :  { %2648 = vrcp.f32 %v2145_v60 }
 0xfe0   :  { %v2649_v61 = vpop.eup %2648 }
 0xfe1   :  { %v2147_v62 = vmul.f32 %v2649_v61, %v2647_v56 }
 0xfe3   :  { %2573 = vmatmul.mubr.msk.f32.vlgmr.msra.gmra.mrb[24].mxu0 %vm384_vm2, %v2147_v62 }
0x10b6   :  { %v2220_v31 = vpop.f32.mrb[24].mxu0 }
0x10b7   :  { %v2574_v63 = vpop.f32.mrb[25].mxu0  ;;  %2578 = vmatmul.mubr.msk.f32.vlgmr.msra.gmra.mrb[26].mxu1 %vm384_vm2, %v2220_v31 }
0x118a   :  { %v2293_v0 = vpop.f32.mrb[26].mxu1 }
0x118b   :  { %v2297_v1 = vadd.f32 %v2293_v0, %v2058_v58  ;;  %v2579_v2 = vpop.f32.mrb[27].mxu1 }
0x118d   :  { %v2298_v3 = vadd.f32 %v3148_v6, %v2297_v1 }
0x118f   :  { %2299 = vst.msk [vmem:[#allocation13 + $0x8] sm:$0xff] %vm125_vm0, %v2298_v3 }
0x1190   :  { %2793 = shalt.err (!%p2790_p10)
}
0x1191   :  { %s2794_s30 = scalar_lea.hbm %s3228_s8, 256 }
0x1192   :  { %p2795_p11 = scmp.ne.s32.totalorder %s3228_s8, %s2794_s30  ;;  %p2798_p12 = scmp.lt.u32.totalorder %s2794_s30, %s3228_s8 }
0x1194   :  { %p2800_p13 = pnand %p2798_p12, %p2795_p11 }
0x1196   :  { %2803 = shalt.err (!%p2800_p13)
}
0x1197   :  { %2311 = dma.vmem_to_hbm [thread:$0]  %s2306_s19, 256, %s3228_s8, [#allocation4], %s2816_s17, %s2816_s17, %s2817_s18  }
0x1198   :  { %2812 = dma.done.wait [#allocation4], 256  }
0x1199   :  { %2813 = vsyncadd [#allocation4], 4294967040 }
0x119a   :  { %2315 = vsyncpa [#allocation3], 1 }
0x119b   :  { %2316 = vsyncpa [#allocation6], 1 }
0x119c   :  { %2317 = vsyncpa [#allocation9], 1 }
0x119d   :  { %2318 = vsyncpa [#allocation12], 1 }
0x119e   :  { %2319 = vsyncpa [#allocation4], 1 }

</bundles_post_ra>
